<compile_context>
chip_gen: v5e
topology: v5e:2x2
jax: 0.10.0
libtpu: 0.0.40
codegen_flags: <defaults>
</compile_context>

<pallas_src>
import functools

import jax
import jax.numpy as jnp
from jax.experimental import pallas as pl
from jax.experimental.pallas import tpu as pltpu

GAMMA = 2                 # module default; power is unrolled as multiplies below
NUM_CLASSES = 64          # matches torch.ones(64) focal_weights in the module
_DEFAULT_TILE_N = 1024    # rows per grid step (multiple of 8; ~2 MiB VMEM w/ 2 bufs,
                          # comfortably under the scoped limit on v5e/v6e/v7x)
_PALLAS_MIN_ROWS = 1024   # below this, pure JAX beats the pallas_call launch cost


def _focal_loss_kernel(logits_ref, targets_ref, alpha_ref, out_ref, *, n_valid, tile_n):
    """One batch tile: per-row weighted CE -> focal -> masked partial sum."""
    pid = pl.program_id(0)

    x = logits_ref[...].astype(jnp.float32)        # (tile_n, C)
    t = targets_ref[...]                           # (tile_n, 1) int32
    a = alpha_ref[...].astype(jnp.float32)         # (1, C)

    # Numerically stable log-sum-exp over the class axis.
    m = jnp.max(x, axis=-1, keepdims=True)                                # (tile_n, 1)
    lse = m + jnp.log(jnp.sum(jnp.exp(x - m), axis=-1, keepdims=True))    # (tile_n, 1)

    # One one-hot temporary, reused for both gathers (target logit + class weight).
    # NOTE: targets ride as a (tile_n, 1) i32 block (128-lane padding accepted);
    # a lane-dense (1, N) layout would need a lane->sublane relayout in-kernel.
    cls = jax.lax.broadcasted_iota(jnp.int32, x.shape, 1)                 # (tile_n, C)
    onehot = (cls == t).astype(jnp.float32)                               # (tile_n, C)
    target_logit = jnp.sum(x * onehot, axis=-1, keepdims=True)            # (tile_n, 1)
    w = jnp.sum(a * onehot, axis=-1, keepdims=True)                       # (tile_n, 1)

    # Weighted cross entropy (reduction='none'), then focal re-weighting.
    ce = w * (lse - target_logit)                                         # (tile_n, 1)
    pt = jnp.exp(-ce)
    one_minus_pt = 1.0 - pt
    focal = one_minus_pt * one_minus_pt * ce                              # gamma == 2

    # Mask rows that belong to the zero-padded tail of the last tile.
    row = pid * tile_n + jax.lax.broadcasted_iota(jnp.int32, (tile_n, 1), 0)
    focal = jnp.where(row < n_valid, focal, 0.0)

    # Per-tile partial sum; mean (divide by true N) happens in the wrapper.
    out_ref[...] = jnp.sum(focal).reshape(1, 1, 1)


def focal_loss_pallas(logits, targets, alpha, *, tile_n=_DEFAULT_TILE_N):
    """logits: (N, C) f32, targets: (N,) i32, alpha: (C,) f32 -> scalar f32."""
    n, c = logits.shape
    logits = logits.astype(jnp.float32)
    targets2d = targets.astype(jnp.int32).reshape(n, 1)
    alpha2d = alpha.astype(jnp.float32).reshape(1, c)

    # Tile size: multiple of 8, no larger than the (8-rounded) batch.
    tile_n = max(8, min(tile_n, pl.cdiv(n, 8) * 8))
    tile_n = (tile_n // 8) * 8
    n_pad = pl.cdiv(n, tile_n) * tile_n
    if n_pad != n:
        logits = jnp.pad(logits, ((0, n_pad - n), (0, 0)))
        targets2d = jnp.pad(targets2d, ((0, n_pad - n), (0, 0)))
    num_tiles = n_pad // tile_n

    kernel = functools.partial(_focal_loss_kernel, n_valid=n, tile_n=tile_n)

    partial_sums = pl.pallas_call(
        kernel,
        out_shape=jax.ShapeDtypeStruct((num_tiles, 1, 1), jnp.float32),
        grid=(num_tiles,),
        in_specs=[
            pl.BlockSpec((tile_n, c), lambda i: (i, 0)),   # logits tile
            pl.BlockSpec((tile_n, 1), lambda i: (i, 0)),   # targets tile
            pl.BlockSpec((1, c), lambda i: (0, 0)),        # alpha (broadcast)
        ],
        out_specs=pl.BlockSpec((1, 1, 1), lambda i: (i, 0, 0)),
        compiler_params=pltpu.CompilerParams(
            dimension_semantics=("parallel",),             # independent tiles -> v7x 2-TC
        ),
        cost_estimate=pl.CostEstimate(
            flops=8 * n_pad * c,
            transcendentals=n_pad * (c + 2),
            bytes_accessed=n_pad * c * 4 + n_pad * 4 + num_tiles * 4,
        ),
    )(logits, targets2d, alpha2d)

    return jnp.sum(partial_sums[:, 0, 0]) / jnp.float32(n)


def _focal_loss_ref(logits, targets, alpha):
    """Pure-JAX reference mirroring F.cross_entropy(weight=alpha, reduction='none')."""
    logp = jax.nn.log_softmax(logits.astype(jnp.float32), axis=-1)
    nll = -jnp.take_along_axis(logp, targets[:, None].astype(jnp.int32), axis=-1)[:, 0]
    w = alpha.astype(jnp.float32)[targets]
    ce = w * nll
    pt = jnp.exp(-ce)
    return jnp.mean((1.0 - pt) ** GAMMA * ce)


def focal_loss(logits, targets, alpha, *, tile_n=_DEFAULT_TILE_N):
    """Dispatcher: tiny batches fuse better as plain XLA; large ones use Pallas."""
    if logits.shape[0] < _PALLAS_MIN_ROWS:
        return _focal_loss_ref(logits, targets, alpha)
    return focal_loss_pallas(logits, targets, alpha, tile_n=tile_n)


if __name__ == "__main__":
    key = jax.random.PRNGKey(0)
    k1, k2, k3, k4 = jax.random.split(key, 4)

    # Deterministic parameter init: focal_weights = ones(64).
    alpha = jnp.ones((NUM_CLASSES,), dtype=jnp.float32)

    # Small shape consistent with the module (batch of 64-class logits).
    n_small = 8
    logits_s = jax.random.normal(k1, (n_small, NUM_CLASSES), dtype=jnp.float32)
    targets_s = jax.random.randint(k2, (n_small,), 0, NUM_CLASSES, dtype=jnp.int32)
    loss_s = jax.block_until_ready(focal_loss_pallas(logits_s, targets_s, alpha))
    ref_s = _focal_loss_ref(logits_s, targets_s, alpha)
    assert jnp.allclose(loss_s, ref_s, rtol=1e-4, atol=1e-5), (loss_s, ref_s)

    # Moderate shape exercising the grid, the pipelined tiles and the
    # partial-tile mask (1000 rows, 256-row tiles -> 4 tiles, last one padded).
    n_big = 1000
    logits_b = jax.random.normal(k3, (n_big, NUM_CLASSES), dtype=jnp.float32)
    targets_b = jax.random.randint(k4, (n_big,), 0, NUM_CLASSES, dtype=jnp.int32)
    loss_b = jax.block_until_ready(
        focal_loss_pallas(logits_b, targets_b, alpha, tile_n=256))
    ref_b = _focal_loss_ref(logits_b, targets_b, alpha)
    assert jnp.allclose(loss_b, ref_b, rtol=1e-4, atol=1e-5), (loss_b, ref_b)

    print("KERNEL_OK")
</pallas_src>

<mosaic_0001>
module attributes {stable_mosaic.version = 11 : i64} {
  func.func @_focal_loss_kernel(%arg0: i32, %arg1: memref<8x64xf32, #tpu.memory_space<vmem>>, %arg2: memref<8x1xi32, #tpu.memory_space<vmem>>, %arg3: memref<1x64xf32, #tpu.memory_space<vmem>>, %arg4: memref<1x1x1xf32, #tpu.memory_space<vmem>>) attributes {dimension_semantics = [#tpu.dimension_semantics<parallel>], iteration_bounds = array<i64: 1>, scalar_prefetch = 0 : i64, scratch_operands = 0 : i64, tpu.core_type = #tpu.core_type<tc>, window_params = [{transform_indices = @transform_0, window_bounds = array<i64: 8, 64>}, {transform_indices = @transform_1, window_bounds = array<i64: 8, 1>}, {pipeline_mode = #tpu.pipeline_mode<synchronous>, transform_indices = @transform_2, window_bounds = array<i64: 1, 64>}, {transform_indices = @transform_3, window_bounds = array<i64: 1, 1, 1>}]} {
    %c0 = arith.constant 0 : index
    %c0_0 = arith.constant 0 : index
    %0 = vector.load %arg1[%c0, %c0_0] : memref<8x64xf32, #tpu.memory_space<vmem>>, vector<8x64xf32>
    %c0_1 = arith.constant 0 : index
    %c0_2 = arith.constant 0 : index
    %1 = vector.load %arg2[%c0_1, %c0_2] : memref<8x1xi32, #tpu.memory_space<vmem>>, vector<8x1xi32>
    %c0_3 = arith.constant 0 : index
    %c0_4 = arith.constant 0 : index
    %2 = vector.load %arg3[%c0_3, %c0_4] : memref<1x64xf32, #tpu.memory_space<vmem>>, vector<1x64xf32>
    %cst = arith.constant dense<0xFF800000> : vector<8xf32>
    %3 = vector.multi_reduction <maximumf>, %0, %cst [1] : vector<8x64xf32> to vector<8xf32>
    %4 = vector.shape_cast %3 : vector<8xf32> to vector<8x1xf32>
    %5 = vector.broadcast %4 : vector<8x1xf32> to vector<8x64xf32>
    %6 = arith.subf %0, %5 : vector<8x64xf32>
    %7 = math.exp %6 : vector<8x64xf32>
    %cst_5 = arith.constant dense<0.000000e+00> : vector<8xf32>
    %8 = vector.multi_reduction <add>, %7, %cst_5 [1] : vector<8x64xf32> to vector<8xf32>
    %9 = vector.shape_cast %8 : vector<8xf32> to vector<8x1xf32>
    %10 = math.log %9 : vector<8x1xf32>
    %11 = arith.addf %4, %10 : vector<8x1xf32>
    %12 = tpu.iota {dimensions = array<i32: 1>} : vector<8x64xi32>
    %13 = vector.broadcast %1 : vector<8x1xi32> to vector<8x64xi32>
    %14 = arith.cmpi eq, %12, %13 : vector<8x64xi32>
    %15 = arith.extui %14 : vector<8x64xi1> to vector<8x64xi32>
    %16 = arith.sitofp %15 : vector<8x64xi32> to vector<8x64xf32>
    %17 = arith.mulf %0, %16 : vector<8x64xf32>
    %cst_6 = arith.constant dense<0.000000e+00> : vector<8xf32>
    %18 = vector.multi_reduction <add>, %17, %cst_6 [1] : vector<8x64xf32> to vector<8xf32>
    %19 = vector.shape_cast %18 : vector<8xf32> to vector<8x1xf32>
    %20 = vector.broadcast %2 : vector<1x64xf32> to vector<8x64xf32>
    %21 = arith.mulf %20, %16 : vector<8x64xf32>
    %cst_7 = arith.constant dense<0.000000e+00> : vector<8xf32>
    %22 = vector.multi_reduction <add>, %21, %cst_7 [1] : vector<8x64xf32> to vector<8xf32>
    %23 = vector.shape_cast %22 : vector<8xf32> to vector<8x1xf32>
    %24 = arith.subf %11, %19 : vector<8x1xf32>
    %25 = arith.mulf %23, %24 : vector<8x1xf32>
    %cst_8 = arith.constant 0.000000e+00 : f32
    %26 = vector.broadcast %cst_8 : f32 to vector<8x1xf32>
    %27 = arith.subf %26, %25 : vector<8x1xf32>
    %28 = math.exp %27 : vector<8x1xf32>
    %cst_9 = arith.constant 1.000000e+00 : f32
    %29 = vector.broadcast %cst_9 : f32 to vector<8x1xf32>
    %30 = arith.subf %29, %28 : vector<8x1xf32>
    %31 = arith.mulf %30, %30 : vector<8x1xf32>
    %32 = arith.mulf %31, %25 : vector<8x1xf32>
    %c8_i32 = arith.constant 8 : i32
    %33 = arith.muli %arg0, %c8_i32 : i32
    %34 = tpu.iota {dimensions = array<i32: 0>} : vector<8x1xi32>
    %35 = vector.broadcast %33 : i32 to vector<8x1xi32>
    %36 = arith.addi %35, %34 : vector<8x1xi32>
    %c8_i32_10 = arith.constant 8 : i32
    %37 = vector.broadcast %c8_i32_10 : i32 to vector<8x1xi32>
    %38 = arith.cmpi slt, %36, %37 : vector<8x1xi32>
    %cst_11 = arith.constant 0.000000e+00 : f32
    %39 = vector.broadcast %cst_11 : f32 to vector<8x1xf32>
    %40 = arith.select %38, %32, %39 : vector<8x1xi1>, vector<8x1xf32>
    %41 = vector.shape_cast %40 : vector<8x1xf32> to vector<1x8x1xf32>
    %cst_12 = arith.constant dense<0.000000e+00> : vector<1xf32>
    %42 = vector.multi_reduction <add>, %41, %cst_12 [1, 2] : vector<1x8x1xf32> to vector<1xf32>
    %43 = vector.shape_cast %42 : vector<1xf32> to vector<1x1x1xf32>
    %44 = vector.extract %43[0, 0, 0] : f32 from vector<1x1x1xf32>
    %45 = vector.broadcast %44 : f32 to vector<1x1x1xf32>
    %c0_13 = arith.constant 0 : index
    %c0_14 = arith.constant 0 : index
    %c0_15 = arith.constant 0 : index
    %46 = vector.load %arg4[%c0_13, %c0_14, %c0_15] : memref<1x1x1xf32, #tpu.memory_space<vmem>>, vector<1x1x1xf32>
    tpu.vector_store %arg4[%c0_13, %c0_14, %c0_15], %45 {strides = array<i32>} : memref<1x1x1xf32, #tpu.memory_space<vmem>>, vector<1x1x1xf32>,
    return
  }
  func.func @transform_0(%arg0: i32) -> (i32, i32) {
    %c0_i32 = arith.constant 0 : i32
    %c0_i32_0 = arith.constant 0 : i32
    return %arg0, %c0_i32 : i32, i32
  }
  func.func @transform_1(%arg0: i32) -> (i32, i32) {
    %c0_i32 = arith.constant 0 : i32
    %c0_i32_0 = arith.constant 0 : i32
    return %arg0, %c0_i32 : i32, i32
  }
  func.func @transform_2(%arg0: i32) -> (i32, i32) {
    %c0_i32 = arith.constant 0 : i32
    %c0_i32_0 = arith.constant 0 : i32
    %c0_i32_1 = arith.constant 0 : i32
    return %c0_i32, %c0_i32_0 : i32, i32
  }
  func.func @transform_3(%arg0: i32) -> (i32, i32, i32) {
    %c0_i32 = arith.constant 0 : i32
    %c0_i32_0 = arith.constant 0 : i32
    %c0_i32_1 = arith.constant 0 : i32
    return %arg0, %c0_i32, %c0_i32_0 : i32, i32, i32
  }
}

</mosaic_0001>

<bundles_post_ra>
// kernel: tpu_custom_call.1
= control target key start
LH: loop header
LB: loop body
LE: loop exit
PB: predicated region body
PF: predicated region fallthrough
CT: control target
= control target key end

     0   :  { %vm18_vm0 = vcmask 523264   ;;  %v135_v2 = vmov 0   ;;  %s174_s0 = inlined_call_operand.vmem [shape: f32[8,64], index: 0, kind: input, shape index: {}]   ;;  %s175_s1 = inlined_call_operand.vmem [shape: s32[8,1], index: 1, kind: input, shape index: {}]   ;;  %s176_s2 = inlined_call_operand.vmem [shape: f32[1,64], index: 2, kind: input, shape index: {}]   ;;  %s177_s3 = inlined_call_operand.hbm [shape: f32[1,1,1], index: 3, kind: output, shape index: {}]  }
   0x1   :  { %v15_v0 = vld [vmem:[%s174_s0] sm:$0xff]  ;;  %101 = vset.pattern.permute.xlu0 %v135_v2 }
   0x2   :  { %v19_v1 = vsel %vm18_vm0, %v15_v0, -inf }
   0x3   :  { %8 = vsyncpa [#allocation3], 0  ;;  %20 = vmax.xlane.f32.xlu0 %v19_v1  ;;  %v16_v3 = vld [vmem:[%s175_s1] sm:$0xff]  ;;  %v31_v9 = vlaneseq  ;;  %v136_v13 = vmov 0.0   ;;  %vm65_vm2 = vcmask 7168   ;;  %s137_s1 = smov [#allocation2]  }
   0x4   :  { %v102_v11 = vld [vmem:[%s176_s2] ss:$0 sm:$0xff]  ;;  %s84_s2 = sshll.u32 %s137_s1, 4  ;;  %s86_s19 = sshll.u32 %s177_s3, 4  ;;  %vm77_vm3 = vcmask 0   ;;  %s85_s2 = int_to_ptr.vmem [resolvable:$true] %s84_s2  ;;  %s87_s19 = int_to_ptr.hbm [resolvable:$true] %s86_s19 }
   0x5   :  { %v32_v10 = vand.u32 127, %v31_v9 }
  0x17   :  { %34 = vperm.xlu0 %101, %v16_v3  }
  0x76   :  { %v21_v4 = vpop.xlane.xlu0 %20 }
  0x77   :  { %v22_v5 = vsub.f32 %v15_v0, %v21_v4 }
  0x79   :  { %v23_v6 = vmul.f32 1.442695, %v22_v5 }
  0x7b   :  { %103 = vpow2.f32 %v23_v6 }
  0x81   :  { %v104_v7 = vpop.eup %103 }
  0x82   :  { %v25_v8 = vsel %vm18_vm0, %v104_v7, 0.0 }
  0x83   :  { %26 = vadd.xlane.f32.xlu1 %v25_v8 }
  0x89   :  { %v35_v12 = vpop.permute.xlu0 %34 }
  0x8a   :  { %vm36_vm1 = vcmp.eq.s32.totalorder %v32_v10, %v35_v12 }
  0x8b   :  { %v95_v14 = vsel %vm36_vm1, 1.0, %v136_v13 }
  0x8c   :  { %v46_v15 = vmul.f32 %v102_v11, %v95_v14  ;;  %v39_v16 = vmul.f32 %v95_v14, %v15_v0 }
  0x8e   :  { %v47_v17 = vsel %vm18_vm0, %v46_v15, 0.0  ;;  %v40_v18 = vsel %vm18_vm0, %v39_v16, 0.0 }
  0x8f   :  { %48 = vadd.xlane.f32.xlu2 %v47_v17  ;;  %41 = vadd.xlane.f32.xlu1 %v40_v18 }
  0xf6   :  { %v27_v19 = vpop.xlane.xlu1 %26 }
  0xf7   :  { %105 = vlog2.f32 %v27_v19 }
  0xfd   :  { %v106_v20 = vpop.eup %105 }
  0xfe   :  { %v29_v21 = vmul.f32 0.6931472, %v106_v20 }
 0x100   :  { %v30_v22 = vadd.f32 %v29_v21, %v21_v4 }
 0x102   :  { %v42_v23 = vpop.xlane.xlu1 %41  ;;  %v49_v25 = vpop.xlane.xlu2 %48 }
 0x103   :  { %v50_v24 = vsub.f32 %v30_v22, %v42_v23 }
 0x105   :  { %v51_v26 = vmul.f32 %v50_v24, %v49_v25 }
 0x107   :  { %v52_v27 = vsub.f32 0.0, %v51_v26 }
 0x109   :  { %v53_v28 = vmul.f32 1.442695, %v52_v27 }
 0x10b   :  { %107 = vpow2.f32 %v53_v28 }
 0x111   :  { %v108_v29 = vpop.eup %107 }
 0x112   :  { %v55_v30 = vsub.f32 1.0, %v108_v29 }
 0x114   :  { %v56_v31 = vmul.f32 %v55_v30, %v55_v30 }
 0x116   :  { %v57_v32 = vmul.f32 %v56_v31, %v51_v26 }
 0x118   :  { %v66_v33 = vsel %vm65_vm2, %v57_v32, 0.0 }
 0x119   :  { %67 = vadd.xlane.f32.xlu2 %v66_v33 }
 0x18c   :  { %v68_v34 = vpop.xlane.xlu2 %67 }
 0x18d   :  { %v69_v35 = vrot.slane %v68_v34, 4 }
 0x18f   :  { %v70_v36 = vadd.f32 %v69_v35, %v68_v34 }
 0x191   :  { %v71_v37 = vrot.slane %v70_v36, 2 }
 0x193   :  { %v72_v38 = vadd.f32 %v71_v37, %v70_v36 }
 0x195   :  { %v73_v39 = vrot.slane %v72_v38, 1 }
 0x197   :  { %v74_v40 = vadd.f32 %v73_v39, %v72_v38 }
 0x199   :  { %96 = vpush %v74_v40 }
 0x1ca   :  { %s97_s20 = spop %96 }
 0x1cb   :  { %v76_v41 = vstv %s97_s20 }
 0x1cc   :  { %78 = vst.msk [vmem:[#allocation2] sm:$0x1] %vm77_vm3, %v76_v41 }
 0x1cd   :  { %89 = dma.vmem_to_hbm [thread:$0]  %s85_s2, 16, %s87_s19, [#allocation3]  }
 0x1ce   :  { %133 = dma.done.wait [#allocation3], 16  }
 0x1cf   :  { %134 = vsyncadd [#allocation3], 4294967280 }
 0x1d0   :  { %94 = vsyncpa [#allocation3], 1 }

</bundles_post_ra>
